<compile_context>
chip_gen: v6e
topology: v6e:2x2x1
jax: 0.10.0
libtpu: 0.0.40
codegen_flags: <defaults>
</compile_context>

<pallas_src>
import jax
import jax.numpy as jnp
from jax.experimental import pallas as pl
from jax.experimental.pallas import tpu as pltpu

_LANE = 128


def _make_max_kernel(n_inputs):
    """Kernel computing the elementwise max over `n_inputs` VMEM tiles."""

    def kernel(*refs):
        in_refs = refs[:n_inputs]
        o_ref = refs[n_inputs]
        acc = in_refs[0][...]
        for r in in_refs[1:]:
            acc = jnp.maximum(acc, r[...])
        o_ref[...] = acc

    return kernel


def _choose_tile_rows(rows, n_bufs, itemsize, sublane):
    """Pick a row-tile size: multiple of `sublane`, ~8 MiB total VMEM budget
    across all double-buffered (in + out) blocks -> safe on v5e/v6e/v7x."""
    budget_bytes = 8 * 1024 * 1024
    per_row_bytes = _LANE * itemsize * 2 * n_bufs  # 2x for double buffering
    max_rows = max(sublane, budget_bytes // per_row_bytes)
    tile = min(rows, max_rows, 2048)
    tile = max(sublane, (tile // sublane) * sublane)
    return tile


def _pallas_elementwise_max(arrays):
    """Elementwise max over a list of same-shape arrays via one Pallas call."""
    n = len(arrays)
    if n == 1:
        # stack + max over a singleton axis is the identity; no kernel needed.
        return arrays[0]

    shape = arrays[0].shape
    dtype = arrays[0].dtype
    itemsize = jnp.dtype(dtype).itemsize
    sublane = {4: 8, 2: 16, 1: 32}.get(itemsize, 8)

    total = int(arrays[0].size)
    rows = max(sublane, -(-total // _LANE))            # ceil(total / 128)
    rows = -(-rows // sublane) * sublane               # round up to sublane mult
    padded = rows * _LANE

    # Lane-dense slabs: flatten the whole tensor, pad, reshape to (rows, 128).
    slabs = []
    for a in arrays:
        flat = a.reshape(-1)
        if padded != total:
            flat = jnp.pad(flat, (0, padded - total))
        slabs.append(flat.reshape(rows, _LANE))

    tile_r = _choose_tile_rows(rows, n + 1, itemsize, sublane)
    grid_r = pl.cdiv(rows, tile_r)

    spec = pl.BlockSpec((tile_r, _LANE), lambda i: (i, 0))
    out2 = pl.pallas_call(
        _make_max_kernel(n),
        out_shape=jax.ShapeDtypeStruct((rows, _LANE), dtype),
        grid_spec=pltpu.PrefetchScalarGridSpec(
            num_scalar_prefetch=0,
            grid=(grid_r,),
            in_specs=[spec] * n,
            out_specs=spec,
        ),
        compiler_params=pltpu.CompilerParams(
            dimension_semantics=("parallel",),
        ),
    )(*slabs)

    flat_out = out2.reshape(-1)
    if padded != total:
        flat_out = flat_out[:total]
    return flat_out.reshape(shape)


def pool_aggregator_forward(x, conf=None):
    """JAX/Pallas equivalent of Pool.forward.

    Args:
      x: list/tuple of dicts; each dict has an 'input' array, the last dict
         additionally carries 'adj' (and optionally 'adj_wts', 'nan_idx').
      conf: optional dict; may contain 'dim' (agg_dim).  Because the stacked
         axis is immediately reduced by the max, agg_dim does not change the
         result, so it only participates in semantics, not compute.

    Returns:
      dict with 'adj', 'adj_wts', 'nan_idx' passed through from x[-1] and
      'input' = elementwise max over all xi['input'].
    """
    conf = conf or {}
    output = {}
    output['adj'] = x[-1]['adj']
    output['adj_wts'] = x[-1].get('adj_wts', None)
    output['nan_idx'] = x[-1].get('nan_idx', None)

    dim = x[0]['input'].shape[-1]
    input_list = []
    for inp in x:
        if not inp['input'].shape[-1] == dim:
            raise ValueError(
                'For Pool Aggregator, all input dimensions must match in last dimension'
            )
        input_list.append(inp['input'])

    # conf.get('dim') (agg_dim) is intentionally unused for compute: stacking
    # along agg_dim and reducing that same axis with max is the elementwise
    # max over the list for any agg_dim.
    _ = conf.get('dim', -1)

    output['input'] = _pallas_elementwise_max(input_list)
    return output


if __name__ == "__main__":
    key = jax.random.PRNGKey(0)
    k1, k2, k3, k4, k5 = jax.random.split(key, 5)

    # Small deterministic example: 3 branches feeding the aggregator, each with
    # an 'input' of shape (batch=2, nodes=8, hidden=32); last branch carries
    # the graph structure ('adj', 'adj_wts'); 'nan_idx' is absent -> None.
    in_shape = (2, 8, 32)
    x = [
        {"input": jax.random.normal(k1, in_shape, dtype=jnp.float32)},
        {"input": jax.random.normal(k2, in_shape, dtype=jnp.float32)},
        {
            "input": jax.random.normal(k3, in_shape, dtype=jnp.float32),
            "adj": jax.random.normal(k4, (2, 8, 8), dtype=jnp.float32),
            "adj_wts": jax.random.normal(k5, (2, 8, 8), dtype=jnp.float32),
        },
    ]

    out = pool_aggregator_forward(x, conf={})
    out_ready = {k: (jax.block_until_ready(v) if v is not None else None)
                 for k, v in out.items()}

    # Reference semantics: stack along agg_dim (-1) then max over that dim.
    ref = jnp.max(jnp.stack([inp["input"] for inp in x], axis=-1), axis=-1)

    assert out_ready["input"].shape == in_shape
    assert out_ready["input"].dtype == jnp.float32
    assert bool(jnp.all(out_ready["input"] == ref))
    assert bool(jnp.all(out_ready["adj"] == x[-1]["adj"]))
    assert bool(jnp.all(out_ready["adj_wts"] == x[-1]["adj_wts"]))
    assert out_ready["nan_idx"] is None

    print("KERNEL_OK")
</pallas_src>

<mosaic_0001>
module attributes {stable_mosaic.version = 11 : i64} {
  func.func @kernel(%arg0: i32, %arg1: memref<8x128xf32, #tpu.memory_space<vmem>>, %arg2: memref<8x128xf32, #tpu.memory_space<vmem>>, %arg3: memref<8x128xf32, #tpu.memory_space<vmem>>, %arg4: memref<8x128xf32, #tpu.memory_space<vmem>>) attributes {dimension_semantics = [#tpu.dimension_semantics<parallel>], iteration_bounds = array<i64: 1>, scalar_prefetch = 0 : i64, scratch_operands = 0 : i64, tpu.core_type = #tpu.core_type<tc>, window_params = [{transform_indices = @transform_0, window_bounds = array<i64: 8, 128>}, {transform_indices = @transform_1, window_bounds = array<i64: 8, 128>}, {transform_indices = @transform_2, window_bounds = array<i64: 8, 128>}, {transform_indices = @transform_3, window_bounds = array<i64: 8, 128>}]} {
    %c0 = arith.constant 0 : index
    %c0_0 = arith.constant 0 : index
    %0 = vector.load %arg1[%c0, %c0_0] : memref<8x128xf32, #tpu.memory_space<vmem>>, vector<8x128xf32>
    %c0_1 = arith.constant 0 : index
    %c0_2 = arith.constant 0 : index
    %1 = vector.load %arg2[%c0_1, %c0_2] : memref<8x128xf32, #tpu.memory_space<vmem>>, vector<8x128xf32>
    %2 = arith.maximumf %0, %1 : vector<8x128xf32>
    %c0_3 = arith.constant 0 : index
    %c0_4 = arith.constant 0 : index
    %3 = vector.load %arg3[%c0_3, %c0_4] : memref<8x128xf32, #tpu.memory_space<vmem>>, vector<8x128xf32>
    %4 = arith.maximumf %2, %3 : vector<8x128xf32>
    %c0_5 = arith.constant 0 : index
    %c0_6 = arith.constant 0 : index
    %5 = vector.load %arg4[%c0_5, %c0_6] : memref<8x128xf32, #tpu.memory_space<vmem>>, vector<8x128xf32>
    tpu.vector_store %arg4[%c0_5, %c0_6], %4 {strides = array<i32>} : memref<8x128xf32, #tpu.memory_space<vmem>>, vector<8x128xf32>,
    return
  }
  func.func @transform_0(%arg0: i32) -> (i32, i32) {
    %c0_i32 = arith.constant 0 : i32
    %c0_i32_0 = arith.constant 0 : i32
    return %arg0, %c0_i32 : i32, i32
  }
  func.func @transform_1(%arg0: i32) -> (i32, i32) {
    %c0_i32 = arith.constant 0 : i32
    %c0_i32_0 = arith.constant 0 : i32
    return %arg0, %c0_i32 : i32, i32
  }
  func.func @transform_2(%arg0: i32) -> (i32, i32) {
    %c0_i32 = arith.constant 0 : i32
    %c0_i32_0 = arith.constant 0 : i32
    return %arg0, %c0_i32 : i32, i32
  }
  func.func @transform_3(%arg0: i32) -> (i32, i32) {
    %c0_i32 = arith.constant 0 : i32
    %c0_i32_0 = arith.constant 0 : i32
    return %arg0, %c0_i32 : i32, i32
  }
}

</mosaic_0001>

<bundles_post_ra>
// kernel: tpu_custom_call.1
= control target key start
LH: loop header
LB: loop body
LE: loop exit
PB: predicated region body
PF: predicated region fallthrough
CT: control target
= control target key end

     0   :  { %8 = vsyncpa [#allocation3], 0  ;;  %s198_s0 = inlined_call_operand.hbm [shape: f32[8,128], index: 0, kind: input, shape index: {}]   ;;  %s199_s1 = inlined_call_operand.hbm [shape: f32[8,128], index: 1, kind: input, shape index: {}]   ;;  %s200_s2 = inlined_call_operand.hbm [shape: f32[8,128], index: 2, kind: input, shape index: {}]   ;;  %s201_s3 = inlined_call_operand.hbm [shape: f32[8,128], index: 3, kind: output, shape index: {}]  }
   0x1   :  { %9 = vsyncpa [#allocation6], 0 }
   0x2   :  { %10 = vsyncpa [#allocation4], 0  ;;  %s162_s12 = smov [#allocation5]   ;;  %s163_s14 = smov [#allocation2]  }
   0x3   :  { %s27_s13 = sshll.u32 %s162_s12, 4  ;;  %s17_s15 = sshll.u32 %s163_s14, 4  ;;  %s28_s13 = int_to_ptr.vmem [resolvable:$true] %s27_s13  ;;  %s18_s15 = int_to_ptr.vmem [resolvable:$true] %s17_s15 }
   0x4   :  { %s84_s16 = scalar_lea.vmem %s28_s13, 128  ;;  %p89_p1 = scmp.lt.s32.totalorder %s28_s13, %s28_s13 }
   0x5   :  { %p85_p0 = scmp.ne.s32.totalorder %s28_s13, %s84_s16  ;;  %p90_p2 = scmp.lt.s32.totalorder %s84_s16, %s84_s16 }
   0x7   :  { %p91_p3 = por %p90_p2, %p89_p1 }
   0x9   :  { %p92_p4 = pnand %p91_p3, %p85_p0 }
   0xb   :  { %95 = shalt.err (!%p92_p4)
}
   0xc   :  { %30 = dma.hbm_to_vmem [thread:$0]  %s199_s1, 128, %s28_s13, [#allocation6]  }
   0xd   :  { %s104_s19 = scalar_lea.vmem %s18_s15, 128  ;;  %p109_p6 = scmp.lt.s32.totalorder %s18_s15, %s18_s15 }
   0xe   :  { %p105_p5 = scmp.ne.s32.totalorder %s18_s15, %s104_s19  ;;  %p110_p7 = scmp.lt.s32.totalorder %s104_s19, %s104_s19 }
  0x10   :  { %p111_p8 = por %p110_p7, %p109_p6 }
  0x12   :  { %p112_p9 = pnand %p111_p8, %p105_p5 }
  0x14   :  { %115 = shalt.err (!%p112_p9)
}
  0x15   :  { %20 = dma.hbm_to_vmem [thread:$0]  %s198_s0, 128, %s18_s15, [#allocation3]  }
  0x16   :  { %s164_s22 = smov [#allocation7]  }
  0x17   :  { %s37_s23 = sshll.u32 %s164_s22, 4  ;;  %s38_s23 = int_to_ptr.vmem [resolvable:$true] %s37_s23 }
  0x18   :  { %s124_s24 = scalar_lea.vmem %s38_s23, 128  ;;  %p129_p11 = scmp.lt.s32.totalorder %s38_s23, %s38_s23 }
  0x19   :  { %p125_p10 = scmp.ne.s32.totalorder %s38_s23, %s124_s24  ;;  %p130_p12 = scmp.lt.s32.totalorder %s124_s24, %s124_s24 }
  0x1b   :  { %p131_p13 = por %p130_p12, %p129_p11 }
  0x1d   :  { %p132_p0 = pnand %p131_p13, %p125_p10 }
  0x1f   :  { %135 = shalt.err (!%p132_p0)
}
  0x20   :  { %40 = dma.hbm_to_vmem [thread:$0]  %s200_s2, 128, %s38_s23, [#allocation6]  }
  0x21   :  { %156 = dma.done.wait [#allocation3], 128  }
  0x22   :  { %157 = vsyncadd [#allocation3], 4294967168 }
  0x23   :  { %158 = dma.done.wait [#allocation6], 256  }
  0x24   :  { %159 = vsyncadd [#allocation6], 4294967040  ;;  %v50_v0 = vld [vmem:[#allocation2] sm:$0xff]  ;;  %v51_v1 = vld [vmem:[#allocation5] sm:$0xff]  ;;  %s165_s0 = smov [#allocation8]  }
  0x25   :  { %v53_v2 = vld [vmem:[#allocation7] sm:$0xff]  ;;  %s62_s26 = sshll.u32 %s165_s0, 4  ;;  %v52_v3 = vmax.f32 %v50_v0, %v51_v1  ;;  %s63_s26 = int_to_ptr.vmem [resolvable:$true] %s62_s26 }
  0x26   :  { %s136_s27 = scalar_lea.vmem %s63_s26, 128  ;;  %p141_p2 = scmp.lt.s32.totalorder %s63_s26, %s63_s26 }
  0x27   :  { %v54_v4 = vmax.f32 %v52_v3, %v53_v2  ;;  %p137_p1 = scmp.ne.s32.totalorder %s63_s26, %s136_s27  ;;  %p142_p3 = scmp.lt.s32.totalorder %s136_s27, %s136_s27 }
  0x29   :  { %55 = vst [vmem:[#allocation8] sm:$0xff] %v54_v4  ;;  %p143_p4 = por %p142_p3, %p141_p2 }
  0x2b   :  { %p144_p5 = pnand %p143_p4, %p137_p1 }
  0x2d   :  { %147 = shalt.err (!%p144_p5)
}
  0x2e   :  { %65 = dma.vmem_to_hbm [thread:$0]  %s63_s26, 128, %s201_s3, [#allocation4]  }
  0x2f   :  { %160 = dma.done.wait [#allocation4], 128  }
  0x30   :  { %161 = vsyncadd [#allocation4], 4294967168 }
  0x31   :  { %69 = vsyncpa [#allocation3], 1 }
  0x32   :  { %70 = vsyncpa [#allocation6], 1 }
  0x33   :  { %71 = vsyncpa [#allocation4], 1 }

</bundles_post_ra>
